<compile_context>
chip_gen: v6e
topology: v6e:2x2x1
jax: 0.10.0
libtpu: 0.0.40
codegen_flags: <defaults>
</compile_context>

<pallas_src>
import jax
import jax.numpy as jnp
from jax.experimental import pallas as pl
from jax.experimental.pallas import tpu as pltpu

# ----- module hyperparameters (from the PyTorch script) ---------------------
HIDDEN_SIZE = 10
INPUT_SIZE = 31
SPARSITY_TARGET = 0.1   # training-loss only, not part of forward()
SPARSITY_WEIGHT = 0.1   # training-loss only, not part of forward()

ENC_DIMS = [INPUT_SIZE, 128, 64, 12, HIDDEN_SIZE]
DEC_DIMS = [HIDDEN_SIZE, 12, 64, 128, INPUT_SIZE]
ENC_LAYERS = len(ENC_DIMS) - 1                 # 4
NUM_LAYERS = ENC_LAYERS + len(DEC_DIMS) - 1    # 8
PAD = 128                                      # native lane width / MXU dim


def _sae_kernel(x_ref, w_ref, b_ref, out_ref, hid_ref):
    """Fused 8-layer MLP on one batch tile.

    x_ref:  (B, 128) f32    input, zero-padded in lanes >= 31
    w_ref:  (8, 128, 128) bf16 weights, zero-padded to 128x128 per layer
    b_ref:  (8, 1, 128) f32 biases, zero-padded
    out_ref:(B, 128) f32    sigmoid(decoder) in lanes 0..30
    hid_ref:(B, 128) f32    encoder output in lanes 0..9
    """
    h = x_ref[...]                                    # f32, lane-dense
    for layer in range(NUM_LAYERS):                   # statically unrolled
        acc = jnp.dot(h.astype(jnp.bfloat16), w_ref[layer],
                      preferred_element_type=jnp.float32) + b_ref[layer]
        if layer == ENC_LAYERS - 1:
            # last encoder layer: no activation; this is `hidden`
            hid_ref[...] = acc
            h = acc
        elif layer == NUM_LAYERS - 1:
            # last decoder layer: sigmoid = 1 / (1 + exp(-x)), recip on EUP
            out_ref[...] = pl.reciprocal(1.0 + jnp.exp(-acc), approx=True)
        else:
            h = jnp.maximum(acc, 0.0)                 # ReLU in f32


def _pack_params(params):
    """Pack the 8 (W, b) pairs into one bf16 weight slab + one f32 bias slab,
    each zero-padded to 128 lanes / 128 rows."""
    enc_w, enc_b, dec_w, dec_b = params
    ws = list(enc_w) + list(dec_w)
    bs = list(enc_b) + list(dec_b)
    w_all = jnp.stack([
        jnp.pad(w, ((0, PAD - w.shape[0]), (0, PAD - w.shape[1])))
        for w in ws
    ]).astype(jnp.bfloat16)                           # (8, 128, 128) bf16
    b_all = jnp.stack([
        jnp.pad(b.reshape(1, -1), ((0, 0), (0, PAD - b.shape[-1])))
        for b in bs
    ]).astype(jnp.float32)                            # (8, 1, 128) f32
    return w_all, b_all


def sparse_autoencoder_forward(x, params, *, block_batch=256):
    """x: (batch, INPUT_SIZE) f32.  Returns (output, hidden) like the PyTorch
    module.  batch is padded internally to a multiple of the block size."""
    batch, in_dim = x.shape
    assert in_dim == INPUT_SIZE
    assert block_batch % 8 == 0

    # Adapt the tile down for small batches (no wasted padded-row compute);
    # large batches keep the full block for pipeline-overhead amortization.
    eff_block = min(block_batch, max(8, ((batch + 7) // 8) * 8))

    w_all, b_all = _pack_params(params)

    n_blocks = (batch + eff_block - 1) // eff_block
    padded_batch = n_blocks * eff_block
    # Zero-pad batch rows and feature lanes; zero lanes stay zero through the
    # zero-padded weights, so the computation on the real lanes is exact.
    x_pad = jnp.pad(x.astype(jnp.float32),
                    ((0, padded_batch - batch), (0, PAD - in_dim)))

    x_spec = pl.BlockSpec((eff_block, PAD), lambda i: (i, 0))
    w_spec = pl.BlockSpec((NUM_LAYERS, PAD, PAD), lambda i: (0, 0, 0))
    b_spec = pl.BlockSpec((NUM_LAYERS, 1, PAD), lambda i: (0, 0, 0))
    out_spec = pl.BlockSpec((eff_block, PAD), lambda i: (i, 0))

    out_slab, hid_slab = pl.pallas_call(
        _sae_kernel,
        grid=(n_blocks,),
        in_specs=[x_spec, w_spec, b_spec],
        out_specs=[out_spec, out_spec],
        out_shape=[
            jax.ShapeDtypeStruct((padded_batch, PAD), jnp.float32),
            jax.ShapeDtypeStruct((padded_batch, PAD), jnp.float32),
        ],
        compiler_params=pltpu.CompilerParams(
            dimension_semantics=("parallel",)),
    )(x_pad, w_all, b_all)

    # Lane-dense slabs -> logical shapes (pure layout plumbing in the wrapper).
    output = out_slab[:batch, :INPUT_SIZE]
    hidden = hid_slab[:batch, :HIDDEN_SIZE]
    return output, hidden


def init_params(key):
    """Deterministic init matching PyTorch nn.Linear default:
    W, b ~ U(-1/sqrt(fan_in), 1/sqrt(fan_in)).  Weights stored as (in, out)."""
    def make_layers(key, dims):
        ws, bs = [], []
        for i in range(len(dims) - 1):
            fan_in, fan_out = dims[i], dims[i + 1]
            key, kw, kb = jax.random.split(key, 3)
            bound = 1.0 / jnp.sqrt(jnp.float32(fan_in))
            w = jax.random.uniform(kw, (fan_in, fan_out), jnp.float32, -bound, bound)
            b = jax.random.uniform(kb, (1, fan_out), jnp.float32, -bound, bound)
            ws.append(w)
            bs.append(b)
        return key, ws, bs

    key, enc_w, enc_b = make_layers(key, ENC_DIMS)
    key, dec_w, dec_b = make_layers(key, DEC_DIMS)
    return enc_w, enc_b, dec_w, dec_b


def reference_forward(x, params):
    """Pure-JAX f32 reference of the same forward pass (sanity check)."""
    enc_w, enc_b, dec_w, dec_b = params
    h = x
    for i, (w, b) in enumerate(zip(enc_w, enc_b)):
        h = h @ w + b
        if i < len(enc_w) - 1:
            h = jnp.maximum(h, 0.0)
    hidden = h
    d = hidden
    for i, (w, b) in enumerate(zip(dec_w, dec_b)):
        d = d @ w + b
        if i < len(dec_w) - 1:
            d = jnp.maximum(d, 0.0)
    output = jax.nn.sigmoid(d)
    return output, hidden


if __name__ == "__main__":
    key = jax.random.PRNGKey(0)
    key, kx = jax.random.split(key)

    batch = 16                        # small demo shape; single grid step
    x = jax.random.uniform(kx, (batch, INPUT_SIZE), jnp.float32)
    params = init_params(key)

    output, hidden = sparse_autoencoder_forward(x, params, block_batch=256)
    output = jax.block_until_ready(output)
    hidden = jax.block_until_ready(hidden)

    ref_out, ref_hid = reference_forward(x, params)
    assert output.shape == (batch, INPUT_SIZE)
    assert hidden.shape == (batch, HIDDEN_SIZE)
    # bf16 MXU operands (f32 accumulation) + approx reciprocal -> loose tolerance.
    assert jnp.allclose(output, ref_out, atol=5e-2, rtol=5e-2)
    assert jnp.allclose(hidden, ref_hid, atol=5e-2, rtol=5e-2)

    print("KERNEL_OK")
</pallas_src>

<mosaic_0001>
module attributes {stable_mosaic.version = 11 : i64} {
  func.func @_sae_kernel(%arg0: i32, %arg1: memref<16x128xf32, #tpu.memory_space<vmem>>, %arg2: memref<8x128x128xbf16, #tpu.memory_space<vmem>>, %arg3: memref<8x1x128xf32, #tpu.memory_space<vmem>>, %arg4: memref<16x128xf32, #tpu.memory_space<vmem>>, %arg5: memref<16x128xf32, #tpu.memory_space<vmem>>) attributes {dimension_semantics = [#tpu.dimension_semantics<parallel>], iteration_bounds = array<i64: 1>, scalar_prefetch = 0 : i64, scratch_operands = 0 : i64, tpu.core_type = #tpu.core_type<tc>, window_params = [{transform_indices = @transform_0, window_bounds = array<i64: 16, 128>}, {pipeline_mode = #tpu.pipeline_mode<synchronous>, transform_indices = @transform_1, window_bounds = array<i64: 8, 128, 128>}, {pipeline_mode = #tpu.pipeline_mode<synchronous>, transform_indices = @transform_2, window_bounds = array<i64: 8, 1, 128>}, {transform_indices = @transform_3, window_bounds = array<i64: 16, 128>}, {transform_indices = @transform_4, window_bounds = array<i64: 16, 128>}]} {
    %c0 = arith.constant 0 : index
    %c0_0 = arith.constant 0 : index
    %0 = vector.load %arg1[%c0, %c0_0] : memref<16x128xf32, #tpu.memory_space<vmem>>, vector<16x128xf32>
    %1 = arith.truncf %0 : vector<16x128xf32> to vector<16x128xbf16>
    %c0_1 = arith.constant 0 : index
    %c0_2 = arith.constant 0 : index
    %c0_3 = arith.constant 0 : index
    %2 = vector.load %arg2[%c0_1, %c0_2, %c0_3] : memref<8x128x128xbf16, #tpu.memory_space<vmem>>, vector<1x128x128xbf16>
    %3 = vector.shape_cast %2 : vector<1x128x128xbf16> to vector<128x128xbf16>
    %cst = arith.constant dense<0.000000e+00> : vector<16x128xf32>
    %4 = tpu.matmul %1, %3, %cst {dimension_numbers = #tpu.dot_dimension_numbers<[1], [0], [0], [1], [0, 0, 1, 1], [], []>} : vector<16x128xbf16>, vector<128x128xbf16>, vector<16x128xf32> -> vector<16x128xf32>
    %c0_4 = arith.constant 0 : index
    %c0_5 = arith.constant 0 : index
    %c0_6 = arith.constant 0 : index
    %5 = vector.load %arg3[%c0_4, %c0_5, %c0_6] : memref<8x1x128xf32, #tpu.memory_space<vmem>>, vector<1x1x128xf32>
    %6 = vector.shape_cast %5 : vector<1x1x128xf32> to vector<1x128xf32>
    %7 = vector.broadcast %6 : vector<1x128xf32> to vector<16x128xf32>
    %8 = arith.addf %4, %7 : vector<16x128xf32>
    %cst_7 = arith.constant 0.000000e+00 : f32
    %9 = vector.broadcast %cst_7 : f32 to vector<16x128xf32>
    %10 = arith.maximumf %8, %9 : vector<16x128xf32>
    %11 = arith.truncf %10 : vector<16x128xf32> to vector<16x128xbf16>
    %c1 = arith.constant 1 : index
    %c0_8 = arith.constant 0 : index
    %c0_9 = arith.constant 0 : index
    %12 = vector.load %arg2[%c1, %c0_8, %c0_9] : memref<8x128x128xbf16, #tpu.memory_space<vmem>>, vector<1x128x128xbf16>
    %13 = vector.shape_cast %12 : vector<1x128x128xbf16> to vector<128x128xbf16>
    %cst_10 = arith.constant dense<0.000000e+00> : vector<16x128xf32>
    %14 = tpu.matmul %11, %13, %cst_10 {dimension_numbers = #tpu.dot_dimension_numbers<[1], [0], [0], [1], [0, 0, 1, 1], [], []>} : vector<16x128xbf16>, vector<128x128xbf16>, vector<16x128xf32> -> vector<16x128xf32>
    %c1_11 = arith.constant 1 : index
    %c0_12 = arith.constant 0 : index
    %c0_13 = arith.constant 0 : index
    %15 = vector.load %arg3[%c1_11, %c0_12, %c0_13] : memref<8x1x128xf32, #tpu.memory_space<vmem>>, vector<1x1x128xf32>
    %16 = vector.shape_cast %15 : vector<1x1x128xf32> to vector<1x128xf32>
    %17 = vector.broadcast %16 : vector<1x128xf32> to vector<16x128xf32>
    %18 = arith.addf %14, %17 : vector<16x128xf32>
    %cst_14 = arith.constant 0.000000e+00 : f32
    %19 = vector.broadcast %cst_14 : f32 to vector<16x128xf32>
    %20 = arith.maximumf %18, %19 : vector<16x128xf32>
    %21 = arith.truncf %20 : vector<16x128xf32> to vector<16x128xbf16>
    %c2 = arith.constant 2 : index
    %c0_15 = arith.constant 0 : index
    %c0_16 = arith.constant 0 : index
    %22 = vector.load %arg2[%c2, %c0_15, %c0_16] : memref<8x128x128xbf16, #tpu.memory_space<vmem>>, vector<1x128x128xbf16>
    %23 = vector.shape_cast %22 : vector<1x128x128xbf16> to vector<128x128xbf16>
    %cst_17 = arith.constant dense<0.000000e+00> : vector<16x128xf32>
    %24 = tpu.matmul %21, %23, %cst_17 {dimension_numbers = #tpu.dot_dimension_numbers<[1], [0], [0], [1], [0, 0, 1, 1], [], []>} : vector<16x128xbf16>, vector<128x128xbf16>, vector<16x128xf32> -> vector<16x128xf32>
    %c2_18 = arith.constant 2 : index
    %c0_19 = arith.constant 0 : index
    %c0_20 = arith.constant 0 : index
    %25 = vector.load %arg3[%c2_18, %c0_19, %c0_20] : memref<8x1x128xf32, #tpu.memory_space<vmem>>, vector<1x1x128xf32>
    %26 = vector.shape_cast %25 : vector<1x1x128xf32> to vector<1x128xf32>
    %27 = vector.broadcast %26 : vector<1x128xf32> to vector<16x128xf32>
    %28 = arith.addf %24, %27 : vector<16x128xf32>
    %cst_21 = arith.constant 0.000000e+00 : f32
    %29 = vector.broadcast %cst_21 : f32 to vector<16x128xf32>
    %30 = arith.maximumf %28, %29 : vector<16x128xf32>
    %31 = arith.truncf %30 : vector<16x128xf32> to vector<16x128xbf16>
    %c3 = arith.constant 3 : index
    %c0_22 = arith.constant 0 : index
    %c0_23 = arith.constant 0 : index
    %32 = vector.load %arg2[%c3, %c0_22, %c0_23] : memref<8x128x128xbf16, #tpu.memory_space<vmem>>, vector<1x128x128xbf16>
    %33 = vector.shape_cast %32 : vector<1x128x128xbf16> to vector<128x128xbf16>
    %cst_24 = arith.constant dense<0.000000e+00> : vector<16x128xf32>
    %34 = tpu.matmul %31, %33, %cst_24 {dimension_numbers = #tpu.dot_dimension_numbers<[1], [0], [0], [1], [0, 0, 1, 1], [], []>} : vector<16x128xbf16>, vector<128x128xbf16>, vector<16x128xf32> -> vector<16x128xf32>
    %c3_25 = arith.constant 3 : index
    %c0_26 = arith.constant 0 : index
    %c0_27 = arith.constant 0 : index
    %35 = vector.load %arg3[%c3_25, %c0_26, %c0_27] : memref<8x1x128xf32, #tpu.memory_space<vmem>>, vector<1x1x128xf32>
    %36 = vector.shape_cast %35 : vector<1x1x128xf32> to vector<1x128xf32>
    %37 = vector.broadcast %36 : vector<1x128xf32> to vector<16x128xf32>
    %38 = arith.addf %34, %37 : vector<16x128xf32>
    %c0_28 = arith.constant 0 : index
    %c0_29 = arith.constant 0 : index
    %39 = vector.load %arg5[%c0_28, %c0_29] : memref<16x128xf32, #tpu.memory_space<vmem>>, vector<16x128xf32>
    tpu.vector_store %arg5[%c0_28, %c0_29], %38 {strides = array<i32>} : memref<16x128xf32, #tpu.memory_space<vmem>>, vector<16x128xf32>,
    %40 = arith.truncf %38 : vector<16x128xf32> to vector<16x128xbf16>
    %c4 = arith.constant 4 : index
    %c0_30 = arith.constant 0 : index
    %c0_31 = arith.constant 0 : index
    %41 = vector.load %arg2[%c4, %c0_30, %c0_31] : memref<8x128x128xbf16, #tpu.memory_space<vmem>>, vector<1x128x128xbf16>
    %42 = vector.shape_cast %41 : vector<1x128x128xbf16> to vector<128x128xbf16>
    %cst_32 = arith.constant dense<0.000000e+00> : vector<16x128xf32>
    %43 = tpu.matmul %40, %42, %cst_32 {dimension_numbers = #tpu.dot_dimension_numbers<[1], [0], [0], [1], [0, 0, 1, 1], [], []>} : vector<16x128xbf16>, vector<128x128xbf16>, vector<16x128xf32> -> vector<16x128xf32>
    %c4_33 = arith.constant 4 : index
    %c0_34 = arith.constant 0 : index
    %c0_35 = arith.constant 0 : index
    %44 = vector.load %arg3[%c4_33, %c0_34, %c0_35] : memref<8x1x128xf32, #tpu.memory_space<vmem>>, vector<1x1x128xf32>
    %45 = vector.shape_cast %44 : vector<1x1x128xf32> to vector<1x128xf32>
    %46 = vector.broadcast %45 : vector<1x128xf32> to vector<16x128xf32>
    %47 = arith.addf %43, %46 : vector<16x128xf32>
    %cst_36 = arith.constant 0.000000e+00 : f32
    %48 = vector.broadcast %cst_36 : f32 to vector<16x128xf32>
    %49 = arith.maximumf %47, %48 : vector<16x128xf32>
    %50 = arith.truncf %49 : vector<16x128xf32> to vector<16x128xbf16>
    %c5 = arith.constant 5 : index
    %c0_37 = arith.constant 0 : index
    %c0_38 = arith.constant 0 : index
    %51 = vector.load %arg2[%c5, %c0_37, %c0_38] : memref<8x128x128xbf16, #tpu.memory_space<vmem>>, vector<1x128x128xbf16>
    %52 = vector.shape_cast %51 : vector<1x128x128xbf16> to vector<128x128xbf16>
    %cst_39 = arith.constant dense<0.000000e+00> : vector<16x128xf32>
    %53 = tpu.matmul %50, %52, %cst_39 {dimension_numbers = #tpu.dot_dimension_numbers<[1], [0], [0], [1], [0, 0, 1, 1], [], []>} : vector<16x128xbf16>, vector<128x128xbf16>, vector<16x128xf32> -> vector<16x128xf32>
    %c5_40 = arith.constant 5 : index
    %c0_41 = arith.constant 0 : index
    %c0_42 = arith.constant 0 : index
    %54 = vector.load %arg3[%c5_40, %c0_41, %c0_42] : memref<8x1x128xf32, #tpu.memory_space<vmem>>, vector<1x1x128xf32>
    %55 = vector.shape_cast %54 : vector<1x1x128xf32> to vector<1x128xf32>
    %56 = vector.broadcast %55 : vector<1x128xf32> to vector<16x128xf32>
    %57 = arith.addf %53, %56 : vector<16x128xf32>
    %cst_43 = arith.constant 0.000000e+00 : f32
    %58 = vector.broadcast %cst_43 : f32 to vector<16x128xf32>
    %59 = arith.maximumf %57, %58 : vector<16x128xf32>
    %60 = arith.truncf %59 : vector<16x128xf32> to vector<16x128xbf16>
    %c6 = arith.constant 6 : index
    %c0_44 = arith.constant 0 : index
    %c0_45 = arith.constant 0 : index
    %61 = vector.load %arg2[%c6, %c0_44, %c0_45] : memref<8x128x128xbf16, #tpu.memory_space<vmem>>, vector<1x128x128xbf16>
    %62 = vector.shape_cast %61 : vector<1x128x128xbf16> to vector<128x128xbf16>
    %cst_46 = arith.constant dense<0.000000e+00> : vector<16x128xf32>
    %63 = tpu.matmul %60, %62, %cst_46 {dimension_numbers = #tpu.dot_dimension_numbers<[1], [0], [0], [1], [0, 0, 1, 1], [], []>} : vector<16x128xbf16>, vector<128x128xbf16>, vector<16x128xf32> -> vector<16x128xf32>
    %c6_47 = arith.constant 6 : index
    %c0_48 = arith.constant 0 : index
    %c0_49 = arith.constant 0 : index
    %64 = vector.load %arg3[%c6_47, %c0_48, %c0_49] : memref<8x1x128xf32, #tpu.memory_space<vmem>>, vector<1x1x128xf32>
    %65 = vector.shape_cast %64 : vector<1x1x128xf32> to vector<1x128xf32>
    %66 = vector.broadcast %65 : vector<1x128xf32> to vector<16x128xf32>
    %67 = arith.addf %63, %66 : vector<16x128xf32>
    %cst_50 = arith.constant 0.000000e+00 : f32
    %68 = vector.broadcast %cst_50 : f32 to vector<16x128xf32>
    %69 = arith.maximumf %67, %68 : vector<16x128xf32>
    %70 = arith.truncf %69 : vector<16x128xf32> to vector<16x128xbf16>
    %c7 = arith.constant 7 : index
    %c0_51 = arith.constant 0 : index
    %c0_52 = arith.constant 0 : index
    %71 = vector.load %arg2[%c7, %c0_51, %c0_52] : memref<8x128x128xbf16, #tpu.memory_space<vmem>>, vector<1x128x128xbf16>
    %72 = vector.shape_cast %71 : vector<1x128x128xbf16> to vector<128x128xbf16>
    %cst_53 = arith.constant dense<0.000000e+00> : vector<16x128xf32>
    %73 = tpu.matmul %70, %72, %cst_53 {dimension_numbers = #tpu.dot_dimension_numbers<[1], [0], [0], [1], [0, 0, 1, 1], [], []>} : vector<16x128xbf16>, vector<128x128xbf16>, vector<16x128xf32> -> vector<16x128xf32>
    %c7_54 = arith.constant 7 : index
    %c0_55 = arith.constant 0 : index
    %c0_56 = arith.constant 0 : index
    %74 = vector.load %arg3[%c7_54, %c0_55, %c0_56] : memref<8x1x128xf32, #tpu.memory_space<vmem>>, vector<1x1x128xf32>
    %75 = vector.shape_cast %74 : vector<1x1x128xf32> to vector<1x128xf32>
    %76 = vector.broadcast %75 : vector<1x128xf32> to vector<16x128xf32>
    %77 = arith.addf %73, %76 : vector<16x128xf32>
    %cst_57 = arith.constant 0.000000e+00 : f32
    %78 = vector.broadcast %cst_57 : f32 to vector<16x128xf32>
    %79 = arith.subf %78, %77 : vector<16x128xf32>
    %80 = math.exp %79 : vector<16x128xf32>
    %cst_58 = arith.constant 1.000000e+00 : f32
    %81 = vector.broadcast %cst_58 : f32 to vector<16x128xf32>
    %82 = arith.addf %81, %80 : vector<16x128xf32>
    %83 = tpu.reciprocal %82 {approx = true} : vector<16x128xf32> -> vector<16x128xf32>
    %c0_59 = arith.constant 0 : index
    %c0_60 = arith.constant 0 : index
    %84 = vector.load %arg4[%c0_59, %c0_60] : memref<16x128xf32, #tpu.memory_space<vmem>>, vector<16x128xf32>
    tpu.vector_store %arg4[%c0_59, %c0_60], %83 {strides = array<i32>} : memref<16x128xf32, #tpu.memory_space<vmem>>, vector<16x128xf32>,
    return
  }
  func.func @transform_0(%arg0: i32) -> (i32, i32) {
    %c0_i32 = arith.constant 0 : i32
    %c0_i32_0 = arith.constant 0 : i32
    return %arg0, %c0_i32 : i32, i32
  }
  func.func @transform_1(%arg0: i32) -> (i32, i32, i32) {
    %c0_i32 = arith.constant 0 : i32
    %c0_i32_0 = arith.constant 0 : i32
    %c0_i32_1 = arith.constant 0 : i32
    %c0_i32_2 = arith.constant 0 : i32
    return %c0_i32, %c0_i32_0, %c0_i32_1 : i32, i32, i32
  }
  func.func @transform_2(%arg0: i32) -> (i32, i32, i32) {
    %c0_i32 = arith.constant 0 : i32
    %c0_i32_0 = arith.constant 0 : i32
    %c0_i32_1 = arith.constant 0 : i32
    %c0_i32_2 = arith.constant 0 : i32
    return %c0_i32, %c0_i32_0, %c0_i32_1 : i32, i32, i32
  }
  func.func @transform_3(%arg0: i32) -> (i32, i32) {
    %c0_i32 = arith.constant 0 : i32
    %c0_i32_0 = arith.constant 0 : i32
    return %arg0, %c0_i32 : i32, i32
  }
  func.func @transform_4(%arg0: i32) -> (i32, i32) {
    %c0_i32 = arith.constant 0 : i32
    %c0_i32_0 = arith.constant 0 : i32
    return %arg0, %c0_i32 : i32, i32
  }
}

</mosaic_0001>

<bundles_post_ra>
// kernel: tpu_custom_call.1
= control target key start
LH: loop header
LB: loop body
LE: loop exit
PB: predicated region body
PF: predicated region fallthrough
CT: control target
= control target key end

     0   :  { %10 = vsyncpa [#allocation3], 0  ;;  %s1679_s0 = inlined_call_operand.hbm [shape: f32[16,128], index: 0, kind: input, shape index: {}]   ;;  %s1680_s1 = inlined_call_operand.hbm [shape: bf16[8,128,128], index: 1, kind: input, shape index: {}]   ;;  %s1681_s2 = inlined_call_operand.hbm [shape: f32[8,1,128], index: 2, kind: input, shape index: {}]   ;;  %s1682_s3 = inlined_call_operand.hbm [shape: f32[16,128], index: 3, kind: output, shape index: {0}]   ;;  %s1683_s4 = inlined_call_operand.hbm [shape: f32[16,128], index: 4, kind: output, shape index: {1}]  }
   0x1   :  { %11 = vsyncpa [#allocation6], 0 }
   0x2   :  { %12 = vsyncpa [#allocation4], 0 }
   0x3   :  { %13 = vsyncpa [#allocation10], 0  ;;  %s1537_s15 = smov [#allocation5]  }
   0x4   :  { %s31_s16 = sshll.u32 %s1537_s15, 4  ;;  %s32_s16 = int_to_ptr.vmem [resolvable:$true] %s31_s16 }
   0x5   :  { %s1437_s17 = scalar_lea.vmem %s32_s16, 8192  ;;  %p1442_p1 = scmp.lt.s32.totalorder %s32_s16, %s32_s16 }
   0x6   :  { %p1438_p0 = scmp.ne.s32.totalorder %s32_s16, %s1437_s17  ;;  %p1443_p2 = scmp.lt.s32.totalorder %s1437_s17, %s1437_s17 }
   0x8   :  { %p1444_p3 = por %p1443_p2, %p1442_p1 }
   0xa   :  { %p1445_p4 = pnand %p1444_p3, %p1438_p0 }
   0xc   :  { %1448 = shalt.err (!%p1445_p4)
}
   0xd   :  { %s1538_s18 = smov 64   ;;  %s1539_s19 = smov 4  }
   0xe   :  { %37 = dma.hbm_to_vmem [thread:$0]  %s1680_s1, 8192, %s32_s16, [#allocation6], %s1538_s18, %s1538_s18, %s1539_s19  }
   0xf   :  { %s1540_s22 = smov [#allocation2]  }
  0x10   :  { %s19_s23 = sshll.u32 %s1540_s22, 4  ;;  %s20_s23 = int_to_ptr.vmem [resolvable:$true] %s19_s23 }
  0x11   :  { %s1457_s24 = scalar_lea.vmem %s20_s23, 256  ;;  %p1462_p6 = scmp.lt.s32.totalorder %s20_s23, %s20_s23 }
  0x12   :  { %p1458_p5 = scmp.ne.s32.totalorder %s20_s23, %s1457_s24  ;;  %p1463_p7 = scmp.lt.s32.totalorder %s1457_s24, %s1457_s24 }
  0x14   :  { %p1464_p8 = por %p1463_p7, %p1462_p6 }
  0x16   :  { %p1465_p9 = pnand %p1464_p8, %p1458_p5 }
  0x18   :  { %1468 = shalt.err (!%p1465_p9)
}
  0x19   :  { %s1541_s25 = smov 128   ;;  %s1542_s26 = smov 8  }
  0x1a   :  { %25 = dma.hbm_to_vmem [thread:$0]  %s1679_s0, 256, %s20_s23, [#allocation3], %s1541_s25, %s1541_s25, %s1542_s26  }
  0x1b   :  { %s1543_s1 = smov [#allocation7]  }
  0x1c   :  { %s43_s29 = sshll.u32 %s1543_s1, 4  ;;  %s44_s29 = int_to_ptr.vmem [resolvable:$true] %s43_s29 }
  0x1d   :  { %s1477_s30 = scalar_lea.vmem %s44_s29, 128  ;;  %p1482_p11 = scmp.lt.s32.totalorder %s44_s29, %s44_s29 }
  0x1e   :  { %p1478_p10 = scmp.ne.s32.totalorder %s44_s29, %s1477_s30  ;;  %p1483_p12 = scmp.lt.s32.totalorder %s1477_s30, %s1477_s30 }
  0x20   :  { %p1484_p13 = por %p1483_p12, %p1482_p11 }
  0x22   :  { %p1485_p0 = pnand %p1484_p13, %p1478_p10 }
  0x24   :  { %1488 = shalt.err (!%p1485_p0)
}
  0x25   :  { %s1544_s5 = smov 16   ;;  %s1545_s6 = smov 1  }
  0x26   :  { %49 = dma.hbm_to_vmem [thread:$0]  %s1681_s2, 128, %s44_s29, [#allocation6], %s1544_s5, %s1544_s5, %s1545_s6  }
  0x27   :  { %1529 = dma.done.wait [#allocation3], 256  }
  0x28   :  { %1530 = vsyncadd [#allocation3], 4294967040 }
  0x29   :  { %1531 = dma.done.wait [#allocation6], 8320  }
  0x2a   :  { %1532 = vsyncadd [#allocation6], 4294958976  ;;  %v1546_v0 = vmov 0.0   ;;  %vm1547_vm0 = vmmov 0   ;;  %v1357_v1 = vld [vmem:[#allocation5 + $0x38] sm:$0xff]   ;;  %v1358_v2 = vld [vmem:[#allocation5 + $0x30] sm:$0xff]  }
  0x2b   :  { %1184 = vmatprep.subr.bf16.mxu0 %v1546_v0  ;;  %1200 = vmatprep.mubr.msk.bf16.mxu0 %vm1547_vm0, %v1546_v0  ;;  %v1359_v3 = vld [vmem:[#allocation5 + $0x28] sm:$0xff]   ;;  %v1365_v4 = vld [vmem:[#allocation5 + $0x78] sm:$0xff]   ;;  %v1360_v5 = vld [vmem:[#allocation5 + $0x20] sm:$0xff]   ;;  %s1548_s0 = smov [#allocation9]  }
  0x2c   :  { %1204 = vmatprep.subr.bf16.mxu1 %v1546_v0  ;;  %1220 = vmatprep.mubr.msk.bf16.mxu1 %vm1547_vm0, %v1546_v0  ;;  %v1366_v6 = vld [vmem:[#allocation5 + $0x70] sm:$0xff]   ;;  %v1361_v7 = vld [vmem:[#allocation5 + $0x18] sm:$0xff]   ;;  %v1367_v8 = vld [vmem:[#allocation5 + $0x68] sm:$0xff]   ;;  %s1023_s2 = sshll.u32 %s1548_s0, 4  ;;  %s1024_s2 = int_to_ptr.vmem [resolvable:$true] %s1023_s2 }
  0x2d   :  { %1185 = vmatpush3.bf16.msra.mxu0 %v1357_v1  ;;  %1205 = vmatpush3.bf16.msra.mxu1 %v1365_v4  ;;  %v1362_v9 = vld [vmem:[#allocation5 + $0x10] sm:$0xff]   ;;  %v1368_v10 = vld [vmem:[#allocation5 + $0x60] sm:$0xff]   ;;  %v1363_v11 = vld [vmem:[#allocation5 + $0x8] sm:$0xff]   ;;  %s1489_s9 = scalar_lea.vmem %s1024_s2, 256  ;;  %p1494_p2 = scmp.lt.s32.totalorder %s1024_s2, %s1024_s2 }
  0x2e   :  { %1186 = vmatprep.subr.bf16.mxu0 %v1546_v0  ;;  %1206 = vmatprep.subr.bf16.mxu1 %v1546_v0  ;;  %v1369_v12 = vld [vmem:[#allocation5 + $0x58] sm:$0xff]   ;;  %v1364_v13 = vld [vmem:[#allocation5] sm:$0xff]   ;;  %v60_v14 = vld [vmem:[#allocation2] sm:$0xff]  ;;  %p1490_p1 = scmp.ne.s32.totalorder %s1024_s2, %s1489_s9  ;;  %p1495_p3 = scmp.lt.s32.totalorder %s1489_s9, %s1489_s9 }
  0x2f   :  { %v61_v15 = vld [vmem:[#allocation2 + $0x8] sm:$0xff]  ;;  %v1370_v17 = vld [vmem:[#allocation5 + $0x50] sm:$0xff]   ;;  %v1371_v18 = vld [vmem:[#allocation5 + $0x48] sm:$0xff]  }
  0x30   :  { %v62_v16 = vpack.c.bf16 %v61_v15, %v60_v14  ;;  %v1372_v19 = vld [vmem:[#allocation5 + $0x40] sm:$0xff]   ;;  %v1373_v20 = vld [vmem:[#allocation5 + $0xb8] sm:$0xff]   ;;  %v1374_v21 = vld [vmem:[#allocation5 + $0xb0] sm:$0xff]   ;;  %p1496_p4 = por %p1495_p3, %p1494_p2 }
  0x31   :  { %1187 = vmatpush3.bf16.msra.mxu0 %v1358_v2  ;;  %1207 = vmatpush3.bf16.msra.mxu1 %v1366_v6  ;;  %v1375_v22 = vld [vmem:[#allocation5 + $0xa8] sm:$0xff]   ;;  %v1376_v23 = vld [vmem:[#allocation5 + $0xa0] sm:$0xff]   ;;  %v1377_v24 = vld [vmem:[#allocation5 + $0x98] sm:$0xff]  }
  0x32   :  { %1188 = vmatprep.subr.bf16.mxu0 %v1546_v0  ;;  %1208 = vmatprep.subr.bf16.mxu1 %v1546_v0  ;;  %v1040_v25 = vld [vmem:[#allocation7] ss:$0 sm:$0xff]  ;;  %v1378_v35 = vld [vmem:[#allocation5 + $0x90] sm:$0xff]   ;;  %v1379_v36 = vld [vmem:[#allocation5 + $0x88] sm:$0xff]   ;;  %p1497_p5 = pnand %p1496_p4, %p1490_p1 }
  0x33   :  { %v1380_v37 = vld [vmem:[#allocation5 + $0x80] sm:$0xff]   ;;  %v1381_v38 = vld [vmem:[#allocation5 + $0xf8] sm:$0xff]   ;;  %v1382_v39 = vld [vmem:[#allocation5 + $0xf0] sm:$0xff]  }
  0x34   :  { %v1383_v40 = vld [vmem:[#allocation5 + $0xe8] sm:$0xff]   ;;  %v1384_v41 = vld [vmem:[#allocation5 + $0xe0] sm:$0xff]   ;;  %v1385_v42 = vld [vmem:[#allocation5 + $0xd8] sm:$0xff]  }
  0x35   :  { %1189 = vmatpush3.bf16.msra.mxu0 %v1359_v3  ;;  %1209 = vmatpush3.bf16.msra.mxu1 %v1367_v8  ;;  %v1049_v43 = vld [vmem:[#allocation7 + $0x1] ss:$0 sm:$0xff]  ;;  %v1386_v53 = vld [vmem:[#allocation5 + $0xd0] sm:$0xff]   ;;  %v1387_v54 = vld [vmem:[#allocation5 + $0xc8] sm:$0xff]  }
  0x36   :  { %1190 = vmatprep.subr.bf16.mxu0 %v1546_v0  ;;  %1210 = vmatprep.subr.bf16.mxu1 %v1546_v0  ;;  %v1388_v55 = vld [vmem:[#allocation5 + $0xc0] sm:$0xff]   ;;  %v1389_v56 = vld [vmem:[#allocation5 + $0x138] sm:$0xff]   ;;  %v1390_v57 = vld [vmem:[#allocation5 + $0x130] sm:$0xff]  }
  0x37   :  { %v1391_v58 = vld [vmem:[#allocation5 + $0x128] sm:$0xff]   ;;  %v1392_v59 = vld [vmem:[#allocation5 + $0x120] sm:$0xff]   ;;  %v1393_v60 = vld [vmem:[#allocation5 + $0x118] sm:$0xff]  }
  0x38   :  { %v1394_v61 = vld [vmem:[#allocation5 + $0x110] sm:$0xff]   ;;  %v1058_v62 = vld [vmem:[#allocation7 + $0x2] ss:$0 sm:$0xff]  ;;  %v1401_v15 = vld [vmem:[#allocation5 + $0x158] sm:$0xff]  }
  0x39   :  { %1191 = vmatpush3.bf16.msra.mxu0 %v1360_v5  ;;  %1211 = vmatpush3.bf16.msra.mxu1 %v1368_v10  ;;  %v1396_v10 = vld [vmem:[#allocation5 + $0x100] sm:$0xff]  }
  0x3a   :  { %1192 = vmatprep.subr.bf16.mxu0 %v1546_v0  ;;  %1212 = vmatprep.subr.bf16.mxu1 %v1546_v0  ;;  %v1400_v14 = vld [vmem:[#allocation5 + $0x160] sm:$0xff]  }
  0x3d   :  { %1193 = vmatpush3.bf16.msra.mxu0 %v1361_v7  ;;  %1213 = vmatpush3.bf16.msra.mxu1 %v1369_v12  ;;  %v1398_v12 = vld [vmem:[#allocation5 + $0x170] sm:$0xff]  }
  0x3e   :  { %1194 = vmatprep.subr.bf16.mxu0 %v1546_v0  ;;  %1214 = vmatprep.subr.bf16.mxu1 %v1546_v0 }
  0x41   :  { %1195 = vmatpush3.bf16.msra.mxu0 %v1362_v9  ;;  %1215 = vmatpush3.bf16.msra.mxu1 %v1370_v17  ;;  %v1395_v9 = vld [vmem:[#allocation5 + $0x108] sm:$0xff]  }
  0x42   :  { %1196 = vmatprep.subr.bf16.mxu0 %v1546_v0  ;;  %1216 = vmatprep.subr.bf16.mxu1 %v1546_v0 }
  0x45   :  { %1197 = vmatpush3.bf16.msra.mxu0 %v1363_v11  ;;  %1217 = vmatpush3.bf16.msra.mxu1 %v1371_v18  ;;  %v1397_v11 = vld [vmem:[#allocation5 + $0x178] sm:$0xff]  }
  0x46   :  { %1198 = vmatprep.subr.bf16.mxu0 %v1546_v0  ;;  %1218 = vmatprep.subr.bf16.mxu1 %v1546_v0 }
  0x49   :  { %1199 = vmatpush3.bf16.msra.mxu0 %v1364_v13  ;;  %1219 = vmatpush3.bf16.msra.mxu1 %v1372_v19  ;;  %v1399_v13 = vld [vmem:[#allocation5 + $0x168] sm:$0xff]  }
  0x4a   :  { %1224 = vmatprep.subr.bf16.mxu0 %v1546_v0  ;;  %1244 = vmatprep.subr.bf16.mxu1 %v1546_v0 }
  0x4c   :  { %1201 = vmatmul.mubr.bf16.vlgmr.msra.gmra.mxu0 %v62_v16  ;;  %v1067_v16 = vld [vmem:[#allocation7 + $0x3] ss:$0 sm:$0xff] }
  0x4d   :  { %1240 = vmatprep.mubr.msk.bf16.mxu0 %vm1547_vm0, %v1546_v0  ;;  %1225 = vmatpush3.bf16.msra.mxu0 %v1373_v20 }
  0x4e   :  { %1226 = vmatprep.subr.bf16.mxu0 %v1546_v0 }
  0x51   :  { %1227 = vmatpush3.bf16.msra.mxu0 %v1374_v21 }
  0x52   :  { %1228 = vmatprep.subr.bf16.mxu0 %v1546_v0 }
  0x55   :  { %1229 = vmatpush3.bf16.msra.mxu0 %v1375_v22 }
  0x56   :  { %1230 = vmatprep.subr.bf16.mxu0 %v1546_v0 }
  0x59   :  { %1231 = vmatpush3.bf16.msra.mxu0 %v1376_v23 }
  0x5a   :  { %1232 = vmatprep.subr.bf16.mxu0 %v1546_v0 }
  0x5d   :  { %1233 = vmatpush3.bf16.msra.mxu0 %v1377_v24  ;;  %v1402_v24 = vld [vmem:[#allocation5 + $0x150] sm:$0xff]  }
  0x5e   :  { %1234 = vmatprep.subr.bf16.mxu0 %v1546_v0 }
  0x61   :  { %1235 = vmatpush3.bf16.msra.mxu0 %v1378_v35 }
  0x62   :  { %1236 = vmatprep.subr.bf16.mxu0 %v1546_v0 }
  0x65   :  { %1237 = vmatpush3.bf16.msra.mxu0 %v1379_v36 }
  0x66   :  { %1238 = vmatprep.subr.bf16.mxu0 %v1546_v0 }
  0x69   :  { %1239 = vmatpush3.bf16.msra.mxu0 %v1380_v37 }
  0x6a   :  { %1264 = vmatprep.subr.bf16.mxu0 %v1546_v0 }
 0x10c   :  { %v168_v26 = vpop.f32.mrf.mxu0 }
 0x10d   :  { %v169_v28 = vadd.f32 %v1040_v25, %v168_v26  ;;  %v1404_v26 = vld [vmem:[#allocation5 + $0x140] sm:$0xff]  }
 0x10e   :  { %v1202_v27 = vpop.f32.mrf.mxu0 }
 0x10f   :  { %v175_v32 = vmax.f32 %v169_v28, 0.0  ;;  %v1405_v27 = vld [vmem:[#allocation5 + $0x1b8] sm:$0xff]   ;;  %v1406_v28 = vld [vmem:[#allocation5 + $0x1b0] sm:$0xff]  }
 0x110   :  { %v171_v29 = vpop.f32.mrf.mxu0 }
 0x111   :  { %v172_v30 = vadd.f32 %v1040_v25, %v171_v29  ;;  %v1403_v25 = vld [vmem:[#allocation5 + $0x148] sm:$0xff]  }
 0x112   :  { %v1203_v31 = vpop.f32.mrf.mxu0  ;;  %v1407_v29 = vld [vmem:[#allocation5 + $0x1a8] sm:$0xff]  }
 0x113   :  { %v176_v33 = vmax.f32 %v172_v30, 0.0  ;;  %v1408_v30 = vld [vmem:[#allocation5 + $0x1a0] sm:$0xff]   ;;  %v1409_v31 = vld [vmem:[#allocation5 + $0x198] sm:$0xff]  }
 0x115   :  { %v177_v34 = vpack.c.bf16 %v176_v33, %v175_v32  ;;  %v1076_v32 = vld [vmem:[#allocation7 + $0x4] ss:$0 sm:$0xff] }
 0x117   :  { %1221 = vmatmul.mubr.bf16.vlgmr.msra.gmra.mxu1 %v177_v34 }
 0x118   :  { %1260 = vmatprep.mubr.msk.bf16.mxu1 %vm1547_vm0, %v1546_v0  ;;  %1245 = vmatpush3.bf16.msra.mxu1 %v1381_v38 }
 0x119   :  { %1246 = vmatprep.subr.bf16.mxu1 %v1546_v0 }
 0x11c   :  { %1247 = vmatpush3.bf16.msra.mxu1 %v1382_v39 }
 0x11d   :  { %1248 = vmatprep.subr.bf16.mxu1 %v1546_v0 }
 0x120   :  { %1249 = vmatpush3.bf16.msra.mxu1 %v1383_v40 }
 0x121   :  { %1250 = vmatprep.subr.bf16.mxu1 %v1546_v0 }
 0x124   :  { %1251 = vmatpush3.bf16.msra.mxu1 %v1384_v41 }
 0x125   :  { %1252 = vmatprep.subr.bf16.mxu1 %v1546_v0 }
 0x128   :  { %1253 = vmatpush3.bf16.msra.mxu1 %v1385_v42  ;;  %v1410_v42 = vld [vmem:[#allocation5 + $0x190] sm:$0xff]  }
 0x129   :  { %1254 = vmatprep.subr.bf16.mxu1 %v1546_v0 }
 0x12c   :  { %1255 = vmatpush3.bf16.msra.mxu1 %v1386_v53 }
 0x12d   :  { %1256 = vmatprep.subr.bf16.mxu1 %v1546_v0 }
 0x130   :  { %1257 = vmatpush3.bf16.msra.mxu1 %v1387_v54 }
 0x131   :  { %1258 = vmatprep.subr.bf16.mxu1 %v1546_v0 }
 0x134   :  { %1259 = vmatpush3.bf16.msra.mxu1 %v1388_v55 }
 0x135   :  { %1284 = vmatprep.subr.bf16.mxu1 %v1546_v0 }
 0x1d7   :  { %v285_v44 = vpop.f32.mrf.mxu1 }
 0x1d8   :  { %v286_v46 = vadd.f32 %v1049_v43, %v285_v44  ;;  %v1412_v44 = vld [vmem:[#allocation5 + $0x180] sm:$0xff]  }
 0x1d9   :  { %v1222_v45 = vpop.f32.mrf.mxu1 }
 0x1da   :  { %v292_v50 = vmax.f32 %v286_v46, 0.0  ;;  %v1413_v45 = vld [vmem:[#allocation5 + $0x1f8] sm:$0xff]   ;;  %v1414_v46 = vld [vmem:[#allocation5 + $0x1f0] sm:$0xff]  }
 0x1db   :  { %v288_v47 = vpop.f32.mrf.mxu1 }
 0x1dc   :  { %v289_v48 = vadd.f32 %v1049_v43, %v288_v47  ;;  %v1411_v43 = vld [vmem:[#allocation5 + $0x188] sm:$0xff]  }
 0x1dd   :  { %v1223_v49 = vpop.f32.mrf.mxu1  ;;  %v1415_v47 = vld [vmem:[#allocation5 + $0x1e8] sm:$0xff]  }
 0x1de   :  { %v293_v51 = vmax.f32 %v289_v48, 0.0  ;;  %v1416_v48 = vld [vmem:[#allocation5 + $0x1e0] sm:$0xff]   ;;  %v1417_v49 = vld [vmem:[#allocation5 + $0x1d8] sm:$0xff]  }
 0x1e0   :  { %v294_v52 = vpack.c.bf16 %v293_v51, %v292_v50  ;;  %v1085_v50 = vld [vmem:[#allocation7 + $0x5] ss:$0 sm:$0xff] }
 0x1e2   :  { %1241 = vmatmul.mubr.bf16.vlgmr.msra.gmra.mxu0 %v294_v52 }
 0x1e3   :  { %1280 = vmatprep.mubr.msk.bf16.mxu0 %vm1547_vm0, %v1546_v0  ;;  %1265 = vmatpush3.bf16.msra.mxu0 %v1389_v56 }
 0x1e4   :  { %1266 = vmatprep.subr.bf16.mxu0 %v1546_v0 }
 0x1e7   :  { %1267 = vmatpush3.bf16.msra.mxu0 %v1390_v57 }
 0x1e8   :  { %1268 = vmatprep.subr.bf16.mxu0 %v1546_v0 }
 0x1eb   :  { %1269 = vmatpush3.bf16.msra.mxu0 %v1391_v58 }
 0x1ec   :  { %1270 = vmatprep.subr.bf16.mxu0 %v1546_v0 }
 0x1ef   :  { %1271 = vmatpush3.bf16.msra.mxu0 %v1392_v59 }
 0x1f0   :  { %1272 = vmatprep.subr.bf16.mxu0 %v1546_v0 }
 0x1f3   :  { %1273 = vmatpush3.bf16.msra.mxu0 %v1393_v60  ;;  %v1418_v60 = vld [vmem:[#allocation5 + $0x1d0] sm:$0xff]  }
 0x1f4   :  { %1274 = vmatprep.subr.bf16.mxu0 %v1546_v0 }
 0x1f7   :  { %1275 = vmatpush3.bf16.msra.mxu0 %v1394_v61  ;;  %v1419_v61 = vld [vmem:[#allocation5 + $0x1c8] sm:$0xff]  }
 0x1f8   :  { %1276 = vmatprep.subr.bf16.mxu0 %v1546_v0 }
 0x1fb   :  { %1277 = vmatpush3.bf16.msra.mxu0 %v1395_v9 }
 0x1fc   :  { %1278 = vmatprep.subr.bf16.mxu0 %v1546_v0 }
 0x1ff   :  { %1279 = vmatpush3.bf16.msra.mxu0 %v1396_v10 }
 0x200   :  { %1304 = vmatprep.subr.bf16.mxu0 %v1546_v0 }
 0x2a2   :  { %v402_v63 = vpop.f32.mrf.mxu0 }
 0x2a3   :  { %v403_v2 = vadd.f32 %v1058_v62, %v402_v63  ;;  %v1094_v63 = vld [vmem:[#allocation7 + $0x6] ss:$0 sm:$0xff] }
 0x2a4   :  { %v1242_v1 = vpop.f32.mrf.mxu0 }
 0x2a5   :  { %v409_v6 = vmax.f32 %v403_v2, 0.0 }
 0x2a6   :  { %v405_v3 = vpop.f32.mrf.mxu0 }
 0x2a7   :  { %v406_v4 = vadd.f32 %v1058_v62, %v405_v3  ;;  %v1420_v62 = vld [vmem:[#allocation5 + $0x1c0] sm:$0xff]  }
 0x2a8   :  { %v1243_v5 = vpop.f32.mrf.mxu0 }
 0x2a9   :  { %v410_v7 = vmax.f32 %v406_v4, 0.0 }
 0x2ab   :  { %v411_v8 = vpack.c.bf16 %v410_v7, %v409_v6 }
 0x2ad   :  { %1261 = vmatmul.mubr.bf16.vlgmr.msra.gmra.mxu1 %v411_v8 }
 0x2ae   :  { %1300 = vmatprep.mubr.msk.bf16.mxu1 %vm1547_vm0, %v1546_v0  ;;  %1285 = vmatpush3.bf16.msra.mxu1 %v1397_v11 }
 0x2af   :  { %1286 = vmatprep.subr.bf16.mxu1 %v1546_v0 }
 0x2b2   :  { %1287 = vmatpush3.bf16.msra.mxu1 %v1398_v12 }
 0x2b3   :  { %1288 = vmatprep.subr.bf16.mxu1 %v1546_v0 }
 0x2b6   :  { %1289 = vmatpush3.bf16.msra.mxu1 %v1399_v13 }
 0x2b7   :  { %1290 = vmatprep.subr.bf16.mxu1 %v1546_v0 }
 0x2ba   :  { %1291 = vmatpush3.bf16.msra.mxu1 %v1400_v14 }
 0x2bb   :  { %1292 = vmatprep.subr.bf16.mxu1 %v1546_v0 }
 0x2be   :  { %1293 = vmatpush3.bf16.msra.mxu1 %v1401_v15 }
 0x2bf   :  { %1294 = vmatprep.subr.bf16.mxu1 %v1546_v0 }
 0x2c2   :  { %1295 = vmatpush3.bf16.msra.mxu1 %v1402_v24 }
 0x2c3   :  { %1296 = vmatprep.subr.bf16.mxu1 %v1546_v0 }
 0x2c6   :  { %1297 = vmatpush3.bf16.msra.mxu1 %v1403_v25 }
 0x2c7   :  { %1298 = vmatprep.subr.bf16.mxu1 %v1546_v0 }
 0x2ca   :  { %1299 = vmatpush3.bf16.msra.mxu1 %v1404_v26 }
 0x2cb   :  { %1324 = vmatprep.subr.bf16.mxu1 %v1546_v0 }
 0x36d   :  { %v519_v17 = vpop.f32.mrf.mxu1 }
 0x36e   :  { %v520_v18 = vadd.f32 %v1067_v16, %v519_v17 }
 0x36f   :  { %v1262_v19 = vpop.f32.mrf.mxu1 }
 0x370   :  { %526 = vst [vmem:[#allocation9] sm:$0xff] %v520_v18 }
 0x371   :  { %v522_v20 = vpop.f32.mrf.mxu1 }
 0x372   :  { %v523_v21 = vadd.f32 %v1067_v16, %v522_v20 }
 0x373   :  { %v1263_v22 = vpop.f32.mrf.mxu1 }
 0x374   :  { %527 = vst [vmem:[#allocation9 + $0x8] sm:$0xff] %v523_v21  ;;  %v528_v23 = vpack.c.bf16 %v523_v21, %v520_v18 }
 0x376   :  { %1281 = vmatmul.mubr.bf16.vlgmr.msra.gmra.mxu0 %v528_v23 }
 0x377   :  { %1320 = vmatprep.mubr.msk.bf16.mxu0 %vm1547_vm0, %v1546_v0  ;;  %1305 = vmatpush3.bf16.msra.mxu0 %v1405_v27 }
 0x378   :  { %1306 = vmatprep.subr.bf16.mxu0 %v1546_v0 }
 0x37b   :  { %1307 = vmatpush3.bf16.msra.mxu0 %v1406_v28 }
 0x37c   :  { %1308 = vmatprep.subr.bf16.mxu0 %v1546_v0 }
 0x37f   :  { %1309 = vmatpush3.bf16.msra.mxu0 %v1407_v29 }
 0x380   :  { %1310 = vmatprep.subr.bf16.mxu0 %v1546_v0 }
 0x383   :  { %1311 = vmatpush3.bf16.msra.mxu0 %v1408_v30 }
 0x384   :  { %1312 = vmatprep.subr.bf16.mxu0 %v1546_v0 }
 0x387   :  { %1313 = vmatpush3.bf16.msra.mxu0 %v1409_v31 }
 0x388   :  { %1314 = vmatprep.subr.bf16.mxu0 %v1546_v0 }
 0x38b   :  { %1315 = vmatpush3.bf16.msra.mxu0 %v1410_v42 }
 0x38c   :  { %1316 = vmatprep.subr.bf16.mxu0 %v1546_v0 }
 0x38f   :  { %1317 = vmatpush3.bf16.msra.mxu0 %v1411_v43 }
 0x390   :  { %1318 = vmatprep.subr.bf16.mxu0 %v1546_v0 }
 0x393   :  { %1319 = vmatpush3.bf16.msra.mxu0 %v1412_v44 }
 0x436   :  { %v636_v33 = vpop.f32.mrf.mxu0 }
 0x437   :  { %v637_v35 = vadd.f32 %v1076_v32, %v636_v33 }
 0x438   :  { %v1282_v34 = vpop.f32.mrf.mxu0 }
 0x439   :  { %v643_v39 = vmax.f32 %v637_v35, 0.0 }
 0x43a   :  { %v639_v36 = vpop.f32.mrf.mxu0 }
 0x43b   :  { %v640_v37 = vadd.f32 %v1076_v32, %v639_v36 }
 0x43c   :  { %v1283_v38 = vpop.f32.mrf.mxu0 }
 0x43d   :  { %v644_v40 = vmax.f32 %v640_v37, 0.0 }
 0x43f   :  { %v645_v41 = vpack.c.bf16 %v644_v40, %v643_v39 }
 0x441   :  { %1301 = vmatmul.mubr.bf16.vlgmr.msra.gmra.mxu1 %v645_v41 }
 0x442   :  { %1340 = vmatprep.mubr.msk.bf16.mxu1 %vm1547_vm0, %v1546_v0  ;;  %1325 = vmatpush3.bf16.msra.mxu1 %v1413_v45 }
 0x443   :  { %1326 = vmatprep.subr.bf16.mxu1 %v1546_v0 }
 0x446   :  { %1327 = vmatpush3.bf16.msra.mxu1 %v1414_v46 }
 0x447   :  { %1328 = vmatprep.subr.bf16.mxu1 %v1546_v0 }
 0x44a   :  { %1329 = vmatpush3.bf16.msra.mxu1 %v1415_v47 }
 0x44b   :  { %1330 = vmatprep.subr.bf16.mxu1 %v1546_v0 }
 0x44e   :  { %1331 = vmatpush3.bf16.msra.mxu1 %v1416_v48 }
 0x44f   :  { %1332 = vmatprep.subr.bf16.mxu1 %v1546_v0 }
 0x452   :  { %1333 = vmatpush3.bf16.msra.mxu1 %v1417_v49 }
 0x453   :  { %1334 = vmatprep.subr.bf16.mxu1 %v1546_v0 }
 0x456   :  { %1335 = vmatpush3.bf16.msra.mxu1 %v1418_v60 }
 0x457   :  { %1336 = vmatprep.subr.bf16.mxu1 %v1546_v0 }
 0x45a   :  { %1337 = vmatpush3.bf16.msra.mxu1 %v1419_v61 }
 0x45b   :  { %1338 = vmatprep.subr.bf16.mxu1 %v1546_v0 }
 0x45e   :  { %1339 = vmatpush3.bf16.msra.mxu1 %v1420_v62 }
 0x501   :  { %v753_v51 = vpop.f32.mrf.mxu1 }
 0x502   :  { %v754_v53 = vadd.f32 %v1085_v50, %v753_v51 }
 0x503   :  { %v1302_v52 = vpop.f32.mrf.mxu1 }
 0x504   :  { %v760_v57 = vmax.f32 %v754_v53, 0.0 }
 0x505   :  { %v756_v54 = vpop.f32.mrf.mxu1 }
 0x506   :  { %v757_v55 = vadd.f32 %v1085_v50, %v756_v54 }
 0x507   :  { %v1303_v56 = vpop.f32.mrf.mxu1 }
 0x508   :  { %v761_v58 = vmax.f32 %v757_v55, 0.0 }
 0x50a   :  { %v762_v59 = vpack.c.bf16 %v761_v58, %v760_v57 }
 0x50c   :  { %1321 = vmatmul.mubr.bf16.vlgmr.msra.gmra.mxu0 %v762_v59 }
 0x5cc   :  { %v870_v1 = vpop.f32.mrf.mxu0 }
 0x5cd   :  { %v871_v3 = vadd.f32 %v1094_v63, %v870_v1 }
 0x5ce   :  { %v1322_v2 = vpop.f32.mrf.mxu0 }
 0x5cf   :  { %v877_v7 = vmax.f32 %v871_v3, 0.0 }
 0x5d0   :  { %v873_v4 = vpop.f32.mrf.mxu0 }
 0x5d1   :  { %v874_v5 = vadd.f32 %v1094_v63, %v873_v4 }
 0x5d2   :  { %v1323_v6 = vpop.f32.mrf.mxu0 }
 0x5d3   :  { %v878_v8 = vmax.f32 %v874_v5, 0.0 }
 0x5d5   :  { %v879_v9 = vpack.c.bf16 %v878_v8, %v877_v7 }
 0x5d7   :  { %1341 = vmatmul.mubr.bf16.vlgmr.msra.gmra.mxu1 %v879_v9 }
 0x5d8   :  { %1500 = shalt.err (!%p1497_p5)
}
 0x5d9   :  { %1029 = dma.vmem_to_hbm [thread:$0]  %s1024_s2, 256, %s1683_s4, [#allocation10], %s1541_s25, %s1541_s25, %s1542_s26   ;;  %v1103_v0 = vld [vmem:[#allocation7 + $0x7] ss:$0 sm:$0xff] }
 0x5da   :  { %s1549_s4 = smov [#allocation8]  }
 0x5db   :  { %s1011_s12 = sshll.u32 %s1549_s4, 4  ;;  %s1012_s12 = int_to_ptr.vmem [resolvable:$true] %s1011_s12 }
 0x5dc   :  { %s1509_s13 = scalar_lea.vmem %s1012_s12, 256  ;;  %p1514_p7 = scmp.lt.s32.totalorder %s1012_s12, %s1012_s12 }
 0x5dd   :  { %p1510_p6 = scmp.ne.s32.totalorder %s1012_s12, %s1509_s13  ;;  %p1515_p8 = scmp.lt.s32.totalorder %s1509_s13, %s1509_s13 }
 0x5df   :  { %p1516_p9 = por %p1515_p8, %p1514_p7 }
 0x5e1   :  { %p1517_p10 = pnand %p1516_p9, %p1510_p6 }
 0x697   :  { %v987_v10 = vpop.f32.mrf.mxu1 }
 0x698   :  { %v988_v11 = vadd.f32 %v1103_v0, %v987_v10 }
 0x699   :  { %v1342_v12 = vpop.f32.mrf.mxu1 }
 0x69a   :  { %v994_v13 = vsub.f32 0.0, %v988_v11 }
 0x69b   :  { %v990_v14 = vpop.f32.mrf.mxu1 }
 0x69c   :  { %v996_v15 = vmul.f32 1.442695, %v994_v13  ;;  %v991_v16 = vadd.f32 %v1103_v0, %v990_v14 }
 0x69d   :  { %v1343_v17 = vpop.f32.mrf.mxu1 }
 0x69e   :  { %1421 = vpow2.f32 %v996_v15  ;;  %v995_v18 = vsub.f32 0.0, %v991_v16 }
 0x6a0   :  { %v998_v19 = vmul.f32 1.442695, %v995_v18 }
 0x6a2   :  { %1423 = vpow2.f32 %v998_v19 }
 0x6ab   :  { %v1422_v20 = vpop.eup %1421 }
 0x6ac   :  { %v1000_v21 = vadd.f32 1.0, %v1422_v20 }
 0x6ae   :  { %1425 = vrcp.f32 %v1000_v21 }
 0x6af   :  { %v1424_v22 = vpop.eup %1423 }
 0x6b0   :  { %v1001_v23 = vadd.f32 1.0, %v1424_v22 }
 0x6b2   :  { %1427 = vrcp.f32 %v1001_v23 }
 0x6bb   :  { %v1426_v24 = vpop.eup %1425 }
 0x6bc   :  { %1004 = vst [vmem:[#allocation8] sm:$0xff] %v1426_v24 }
 0x6bf   :  { %v1428_v25 = vpop.eup %1427 }
 0x6c0   :  { %1005 = vst [vmem:[#allocation8 + $0x8] sm:$0xff] %v1428_v25 }
 0x6c1   :  { %1520 = shalt.err (!%p1517_p10)
}
 0x6c2   :  { %1017 = dma.vmem_to_hbm [thread:$0]  %s1012_s12, 256, %s1682_s3, [#allocation4], %s1541_s25, %s1541_s25, %s1542_s26  }
 0x6c3   :  { %1533 = dma.done.wait [#allocation4], 256  }
 0x6c4   :  { %1534 = vsyncadd [#allocation4], 4294967040 }
 0x6c5   :  { %1535 = dma.done.wait [#allocation10], 256  }
 0x6c6   :  { %1536 = vsyncadd [#allocation10], 4294967040 }
 0x6c7   :  { %1036 = vsyncpa [#allocation3], 1 }
 0x6c8   :  { %1037 = vsyncpa [#allocation6], 1 }
 0x6c9   :  { %1038 = vsyncpa [#allocation4], 1 }
 0x6ca   :  { %1039 = vsyncpa [#allocation10], 1 }

</bundles_post_ra>
